<compile_context>
chip_gen: v7x
topology: tpu7x:2x2x1
jax: 0.10.0
libtpu: 0.0.40
codegen_flags: <defaults>
</compile_context>

<pallas_src>
import jax
import jax.numpy as jnp
import numpy as np
from jax.experimental import pallas as pl
from jax.experimental.pallas import tpu as pltpu


# ----------------------------- Pallas kernel -------------------------------
def _fs_relation_kernel(x_ref, scene_ref, w_ref, b_ref, wp1_ref, out_ref):
    # Block shapes (leading batch index squeezed via `[0]`):
    #   x      : (Cin, TP)  f32   channels on sublanes, spatial on lanes
    #   scene  : (C, 1)     f32   per-batch scene vector (lane-broadcast)
    #   w      : (3C, Cin)  bf16  fused [wc | wf | wp2]^T
    #   b      : (3C, 1)    f32   fused [bc | bf | bp]
    #   wp1    : (C, C)     bf16  project-weight half acting on rel*p (transposed)
    #   out    : (C, TP)    bf16
    C = out_ref.shape[1]

    x = x_ref[0].astype(jnp.bfloat16)          # cast in VMEM; MXU eats bf16

    # Single fused MXU pass: [wc|wf|wp2]^T @ x + [bc|bf|bp]  -> (3C, TP), f32 acc.
    h = jnp.dot(w_ref[...], x, preferred_element_type=jnp.float32) + b_ref[...]

    # One ReLU over the two conv+BN+ReLU slots.  Sublane slices at multiples of
    # 8 are tile-aligned (no relayout copies).
    cf = jnp.maximum(h[:2 * C, :], 0.0)        # (2C, TP)
    content = cf[:C, :]                        # content encoder output
    p = cf[C:, :]                              # feature re-encoder output
    proj_x = h[2 * C:, :]                      # x @ wp2 + bp  (no ReLU on this slot)

    # relation = sigmoid(<content, scene>): f32 multiply + per-lane sublane
    # reduce; sigmoid via exp (EUP) + approx reciprocal (EUP).
    s = jnp.sum(content * scene_ref[0], axis=0, keepdims=True)   # (1, TP)
    rel = pl.reciprocal(1.0 + jnp.exp(-s), approx=True)

    # project(cat([rel*p, x])): (rel*p) @ wp1 == rel * (wp1^T @ p); second MXU
    # pass does not sit behind the sigmoid/reduce dependency chain.
    pw = jnp.dot(wp1_ref[...], p.astype(jnp.bfloat16),
                 preferred_element_type=jnp.float32)             # (C, TP)

    # Dropout2d(p=0.1) is identity in eval mode.  bf16 store (math stays f32).
    out_ref[0] = jnp.maximum(rel * pw + proj_x, 0.0).astype(out_ref.dtype)


def fs_relation_level(x_flat, scene_col, wT_fused, b_col, wp1T,
                      *, max_tp=1024, out_dtype=jnp.bfloat16):
    """x_flat: (N, Cin, HW) f32, scene_col: (N, C, 1) f32,
    wT_fused: (3C, Cin) bf16, b_col: (3C, 1) f32, wp1T: (C, C) bf16.
    Returns (N, C, HW) out_dtype.

    max_tp: lane-tile cap (multiple of 128).  1024 is safe for v7x's 64 MiB
    VMEM; on v6e/v5e (128 MiB) sweeping up to 2048-4096 is worthwhile for
    large levels.
    """
    N, Cin, HW = x_flat.shape
    C3 = wT_fused.shape[0]
    C = C3 // 3

    # Lane tile: multiple of 128 (ragged last tile handled by cdiv grid +
    # Pallas masking), capped at max_tp.  HW <= 128 -> single full block.
    if HW <= 128:
        TP = HW
    else:
        TP = min(max_tp, (HW // 128) * 128)
        # v7x has 2 TensorCores per chip: make sure there are >=2 parallel
        # grid cells so a single-batch / single-tile call doesn't idle a core.
        if N * pl.cdiv(HW, TP) < 2:
            TP = max(128, ((TP // 2) // 128) * 128)

    grid = (N, pl.cdiv(HW, TP))
    full = lambda n, t: (0, 0)

    return pl.pallas_call(
        _fs_relation_kernel,
        out_shape=jax.ShapeDtypeStruct((N, C, HW), out_dtype),
        grid=grid,
        in_specs=[
            pl.BlockSpec((1, Cin, TP), lambda n, t: (n, 0, t)),   # x tile (f32)
            pl.BlockSpec((1, C, 1), lambda n, t: (n, 0, 0)),      # scene vec (f32)
            pl.BlockSpec((C3, Cin), full),                        # fused [wc|wf|wp2]^T
            pl.BlockSpec((C3, 1), full),                          # fused [bc|bf|bp]
            pl.BlockSpec((C, C), full),                           # wp1^T
        ],
        out_specs=pl.BlockSpec((1, C, TP), lambda n, t: (n, 0, t)),
        compiler_params=pltpu.CompilerParams(
            dimension_semantics=("parallel", "parallel")),
    )(x_flat, scene_col, wT_fused, b_col, wp1T)


# ----------------------------- plain-JAX glue -------------------------------
def fold_conv_bn(w, b, gamma, beta, mean, var, eps=1e-5):
    scale = gamma / jnp.sqrt(var + eps)
    return w * scale[None, :], (b - mean) * scale + beta


def group_norm(x, gamma, beta, groups=32, eps=1e-5):
    n, c = x.shape
    xg = x.reshape(n, groups, c // groups)
    mu = xg.mean(axis=-1, keepdims=True)
    var = ((xg - mu) ** 2).mean(axis=-1, keepdims=True)
    xn = ((xg - mu) / jnp.sqrt(var + eps)).reshape(n, c)
    return xn * gamma + beta


def encode_scene(scene_feature, sp):
    # scene_feature: (N, Se, 1, 1) NCHW -> (N, Se); tiny, plain JAX.
    s = scene_feature[:, :, 0, 0]
    h = jnp.maximum(group_norm(s @ sp["w1"] + sp["b1"], sp["g1"], sp["be1"]), 0.0)
    h = jnp.maximum(group_norm(h @ sp["w2"] + sp["b2"], sp["g2"], sp["be2"]), 0.0)
    return h                                                       # (N, C)


def prepare_fused_params(params):
    """One-time weight prep (hoisted out of the forward path): per-level fused
    conv weight [wc|wf|wp2]^T:(3C,Cin) bf16, fused bias (3C,1) f32, and
    wp1^T:(C,C) bf16."""
    C = params["wp1"].shape[1]
    wp1T = jnp.transpose(params["wp1"]).astype(jnp.bfloat16)
    bp = params["bp"]
    levels = []
    for lvl in params["levels"]:
        wT = jnp.transpose(
            jnp.concatenate([lvl["wc"], lvl["wf"], params["wp2"]], axis=1)
        ).astype(jnp.bfloat16)                                     # (3C, Cin)
        b = jnp.concatenate([lvl["bc"], lvl["bf"], bp])[:, None]   # (3C, 1) f32
        levels.append(dict(wT=wT, b=b))
    return dict(levels=levels, wp1T=wp1T, C=C)


def make_params(key, se_channels, out_channels, in_channels_list):
    keys = iter(jax.random.split(key, 128))
    nk = lambda: next(keys)

    def conv(cin, cout, bias=True):
        w = 0.05 * jax.random.normal(nk(), (cin, cout), jnp.float32)
        b = (0.05 * jax.random.normal(nk(), (cout,), jnp.float32)
             if bias else jnp.zeros((cout,), jnp.float32))
        return w, b

    def bn(c):
        gamma = 1.0 + 0.1 * jax.random.normal(nk(), (c,), jnp.float32)
        beta = 0.1 * jax.random.normal(nk(), (c,), jnp.float32)
        mean = 0.1 * jax.random.normal(nk(), (c,), jnp.float32)
        var = 0.5 + 0.5 * jnp.abs(jax.random.normal(nk(), (c,), jnp.float32))
        return gamma, beta, mean, var

    C = out_channels
    params = {}

    # scene encoder (shared): conv(Se->C)+GN+ReLU, conv(C->C)+GN+ReLU
    w1, b1 = conv(se_channels, C)
    w2, b2 = conv(C, C)
    params["scene"] = dict(
        w1=w1, b1=b1,
        g1=1.0 + 0.1 * jax.random.normal(nk(), (C,), jnp.float32),
        be1=0.1 * jax.random.normal(nk(), (C,), jnp.float32),
        w2=w2, b2=b2,
        g2=1.0 + 0.1 * jax.random.normal(nk(), (C,), jnp.float32),
        be2=0.1 * jax.random.normal(nk(), (C,), jnp.float32),
    )

    # shared project: conv(2C->C, bias=False) + BN (folded) + ReLU
    wp, _ = conv(2 * C, C, bias=False)
    wp_f, bp_f = fold_conv_bn(wp, jnp.zeros((C,), jnp.float32), *bn(C))
    params["wp1"] = wp_f[:C]        # acts on rel * p_feat
    params["wp2"] = wp_f[C:]        # acts on original feature (Cin == C)
    params["bp"] = bp_f

    # per-level content / feature-reencoder convs (+ folded BN)
    params["levels"] = []
    for cin in in_channels_list:
        wc, bc = conv(cin, C)
        wc, bc = fold_conv_bn(wc, bc, *bn(C))
        wf, bf = conv(cin, C)
        wf, bf = fold_conv_bn(wf, bf, *bn(C))
        params["levels"].append(dict(wc=wc, bc=bc, wf=wf, bf=bf))
    return params


def fs_relation_v2_forward(scene_feature, features, params, prepped):
    """scene_feature: (N, Se, 1, 1) NCHW; features: list of (N, Cin, H, W) NCHW.
    Returns list of (N, C, H, W) bf16 (NCHW, no transposes anywhere)."""
    scene = encode_scene(scene_feature, params["scene"])           # (N, C) f32
    scene_col = scene[:, :, None]                                  # (N, C, 1)
    C = prepped["C"]

    outs = []
    for i, x in enumerate(features):
        n, cin, h, w = x.shape
        # The module's project conv takes 2*out_channels, i.e. cat([r*p, o])
        # only type-checks when every level's in_channels == out_channels.
        assert cin == C, "FSRelationV2 requires in_channels == out_channels"
        lp = prepped["levels"][i]

        # NCHW -> (N, Cin, HW): layout-preserving reshape, no HBM transpose.
        xf = x.reshape(n, cin, h * w)
        y = fs_relation_level(xf, scene_col, lp["wT"], lp["b"], prepped["wp1T"])
        outs.append(y.reshape(n, C, h, w))                         # still NCHW
    return outs


def ref_forward(scene_feature, features, params):
    scene = encode_scene(scene_feature, params["scene"])
    outs = []
    hp = jax.lax.Precision.HIGHEST
    for i, x in enumerate(features):
        n, cin, h, w = x.shape
        xf = jnp.transpose(x, (0, 2, 3, 1)).reshape(n, h * w, cin)
        lvl = params["levels"][i]
        content = jnp.maximum(
            jnp.dot(xf, lvl["wc"], precision=hp) + lvl["bc"], 0.0)
        rel = jax.nn.sigmoid(
            jnp.sum(content * scene[:, None, :], axis=-1, keepdims=True))
        p = jnp.maximum(jnp.dot(xf, lvl["wf"], precision=hp) + lvl["bf"], 0.0)
        y = jnp.maximum(
            jnp.dot(rel * p, params["wp1"], precision=hp)
            + jnp.dot(xf, params["wp2"], precision=hp) + params["bp"], 0.0)
        outs.append(jnp.transpose(y.reshape(n, h, w, -1), (0, 3, 1, 2)))
    return outs


if __name__ == "__main__":
    key = jax.random.PRNGKey(0)
    N = 2
    SE = 96                   # scene_embedding_channels
    C = 64                    # out_channels (GroupNorm(32, C) requires C % 32 == 0)
    in_channels_list = [64, 64]   # must equal out_channels (see assert above)
    spatials = [16, 8]

    k_par, k_scene, k_f0, k_f1 = jax.random.split(key, 4)
    params = make_params(k_par, SE, C, in_channels_list)
    prepped = prepare_fused_params(params)   # hoisted weight fusion / casts

    scene_feature = jax.random.normal(k_scene, (N, SE, 1, 1), jnp.float32)
    features = [
        jax.random.normal(k_f0, (N, in_channels_list[0], spatials[0], spatials[0]), jnp.float32),
        jax.random.normal(k_f1, (N, in_channels_list[1], spatials[1], spatials[1]), jnp.float32),
    ]

    outs = fs_relation_v2_forward(scene_feature, features, params, prepped)
    outs = [jax.block_until_ready(o) for o in outs]

    refs = ref_forward(scene_feature, features, params)
    refs = [jax.block_until_ready(r) for r in refs]

    # Tolerance covers bf16 MXU inputs, bf16 output store, and the EUP approx
    # reciprocal in the sigmoid (f32 accumulation / elementwise inside).
    for o, r, s in zip(outs, refs, spatials):
        assert o.shape == (N, C, s, s), o.shape
        np.testing.assert_allclose(
            np.asarray(o.astype(jnp.float32)), np.asarray(r),
            rtol=2e-2, atol=2e-2)

    print("KERNEL_OK")
</pallas_src>

<mosaic_0001>
module attributes {stable_mosaic.version = 11 : i64} {
  func.func @_fs_relation_kernel(%arg0: i32, %arg1: i32, %arg2: memref<1x64x256xf32, #tpu.memory_space<vmem>>, %arg3: memref<1x64x1xf32, #tpu.memory_space<vmem>>, %arg4: memref<192x64xbf16, #tpu.memory_space<vmem>>, %arg5: memref<192x1xf32, #tpu.memory_space<vmem>>, %arg6: memref<64x64xbf16, #tpu.memory_space<vmem>>, %arg7: memref<1x64x256xbf16, #tpu.memory_space<vmem>>) attributes {dimension_semantics = [#tpu.dimension_semantics<parallel>, #tpu.dimension_semantics<parallel>], iteration_bounds = array<i64: 2, 1>, scalar_prefetch = 0 : i64, scratch_operands = 0 : i64, tpu.core_type = #tpu.core_type<tc>, window_params = [{transform_indices = @transform_0, window_bounds = array<i64: 1, 64, 256>}, {transform_indices = @transform_1, window_bounds = array<i64: 1, 64, 1>}, {pipeline_mode = #tpu.pipeline_mode<synchronous>, transform_indices = @transform_2, window_bounds = array<i64: 192, 64>}, {pipeline_mode = #tpu.pipeline_mode<synchronous>, transform_indices = @transform_3, window_bounds = array<i64: 192, 1>}, {pipeline_mode = #tpu.pipeline_mode<synchronous>, transform_indices = @transform_4, window_bounds = array<i64: 64, 64>}, {transform_indices = @transform_5, window_bounds = array<i64: 1, 64, 256>}]} {
    %c0 = arith.constant 0 : index
    %c0_0 = arith.constant 0 : index
    %c0_1 = arith.constant 0 : index
    %0 = vector.load %arg2[%c0, %c0_0, %c0_1] : memref<1x64x256xf32, #tpu.memory_space<vmem>>, vector<1x64x256xf32>
    %1 = vector.shape_cast %0 : vector<1x64x256xf32> to vector<64x256xf32>
    %2 = arith.truncf %1 : vector<64x256xf32> to vector<64x256xbf16>
    %c0_2 = arith.constant 0 : index
    %c0_3 = arith.constant 0 : index
    %3 = vector.load %arg4[%c0_2, %c0_3] : memref<192x64xbf16, #tpu.memory_space<vmem>>, vector<192x64xbf16>
    %cst = arith.constant dense<0.000000e+00> : vector<192x256xf32>
    %4 = tpu.matmul %3, %2, %cst {dimension_numbers = #tpu.dot_dimension_numbers<[1], [0], [0], [1], [0, 0, 1, 1], [], []>} : vector<192x64xbf16>, vector<64x256xbf16>, vector<192x256xf32> -> vector<192x256xf32>
    %c0_4 = arith.constant 0 : index
    %c0_5 = arith.constant 0 : index
    %5 = vector.load %arg5[%c0_4, %c0_5] : memref<192x1xf32, #tpu.memory_space<vmem>>, vector<192x1xf32>
    %6 = vector.broadcast %5 : vector<192x1xf32> to vector<192x256xf32>
    %7 = arith.addf %4, %6 : vector<192x256xf32>
    %8 = vector.extract_strided_slice %7 {offsets = [0, 0], sizes = [128, 256], strides = [1, 1]} : vector<192x256xf32> to vector<128x256xf32>
    %cst_6 = arith.constant 0.000000e+00 : f32
    %9 = vector.broadcast %cst_6 : f32 to vector<128x256xf32>
    %10 = arith.maximumf %8, %9 : vector<128x256xf32>
    %11 = vector.extract_strided_slice %10 {offsets = [0, 0], sizes = [64, 256], strides = [1, 1]} : vector<128x256xf32> to vector<64x256xf32>
    %12 = vector.extract_strided_slice %10 {offsets = [64, 0], sizes = [64, 256], strides = [1, 1]} : vector<128x256xf32> to vector<64x256xf32>
    %13 = vector.extract_strided_slice %7 {offsets = [128, 0], sizes = [64, 256], strides = [1, 1]} : vector<192x256xf32> to vector<64x256xf32>
    %c0_7 = arith.constant 0 : index
    %c0_8 = arith.constant 0 : index
    %c0_9 = arith.constant 0 : index
    %14 = vector.load %arg3[%c0_7, %c0_8, %c0_9] : memref<1x64x1xf32, #tpu.memory_space<vmem>>, vector<1x64x1xf32>
    %15 = vector.shape_cast %14 : vector<1x64x1xf32> to vector<64x1xf32>
    %16 = vector.broadcast %15 : vector<64x1xf32> to vector<64x256xf32>
    %17 = arith.mulf %11, %16 : vector<64x256xf32>
    %cst_10 = arith.constant dense<0.000000e+00> : vector<256xf32>
    %18 = vector.multi_reduction <add>, %17, %cst_10 [0] : vector<64x256xf32> to vector<256xf32>
    %19 = vector.shape_cast %18 : vector<256xf32> to vector<1x256xf32>
    %cst_11 = arith.constant 0.000000e+00 : f32
    %20 = vector.broadcast %cst_11 : f32 to vector<1x256xf32>
    %21 = arith.subf %20, %19 : vector<1x256xf32>
    %22 = math.exp %21 : vector<1x256xf32>
    %cst_12 = arith.constant 1.000000e+00 : f32
    %23 = vector.broadcast %cst_12 : f32 to vector<1x256xf32>
    %24 = arith.addf %23, %22 : vector<1x256xf32>
    %25 = tpu.reciprocal %24 {approx = true} : vector<1x256xf32> -> vector<1x256xf32>
    %c0_13 = arith.constant 0 : index
    %c0_14 = arith.constant 0 : index
    %26 = vector.load %arg6[%c0_13, %c0_14] : memref<64x64xbf16, #tpu.memory_space<vmem>>, vector<64x64xbf16>
    %27 = arith.truncf %12 : vector<64x256xf32> to vector<64x256xbf16>
    %cst_15 = arith.constant dense<0.000000e+00> : vector<64x256xf32>
    %28 = tpu.matmul %26, %27, %cst_15 {dimension_numbers = #tpu.dot_dimension_numbers<[1], [0], [0], [1], [0, 0, 1, 1], [], []>} : vector<64x64xbf16>, vector<64x256xbf16>, vector<64x256xf32> -> vector<64x256xf32>
    %29 = vector.broadcast %25 : vector<1x256xf32> to vector<64x256xf32>
    %30 = arith.mulf %29, %28 : vector<64x256xf32>
    %31 = arith.addf %30, %13 : vector<64x256xf32>
    %cst_16 = arith.constant 0.000000e+00 : f32
    %32 = vector.broadcast %cst_16 : f32 to vector<64x256xf32>
    %33 = arith.maximumf %31, %32 : vector<64x256xf32>
    %34 = arith.truncf %33 : vector<64x256xf32> to vector<64x256xbf16>
    %c0_17 = arith.constant 0 : index
    %c0_18 = arith.constant 0 : index
    %c0_19 = arith.constant 0 : index
    %35 = vector.load %arg7[%c0_17, %c0_18, %c0_19] : memref<1x64x256xbf16, #tpu.memory_space<vmem>>, vector<1x64x256xbf16>
    %36 = vector.shape_cast %35 : vector<1x64x256xbf16> to vector<64x256xbf16>
    %37 = vector.shape_cast %34 : vector<64x256xbf16> to vector<1x64x256xbf16>
    tpu.vector_store %arg7[%c0_17, %c0_18, %c0_19], %37 {strides = array<i32>} : memref<1x64x256xbf16, #tpu.memory_space<vmem>>, vector<1x64x256xbf16>,
    return
  }
  func.func @transform_0(%arg0: i32, %arg1: i32) -> (i32, i32, i32) {
    %c0_i32 = arith.constant 0 : i32
    %c0_i32_0 = arith.constant 0 : i32
    return %arg0, %c0_i32, %arg1 : i32, i32, i32
  }
  func.func @transform_1(%arg0: i32, %arg1: i32) -> (i32, i32, i32) {
    %c0_i32 = arith.constant 0 : i32
    %c0_i32_0 = arith.constant 0 : i32
    %c0_i32_1 = arith.constant 0 : i32
    return %arg0, %c0_i32, %c0_i32_0 : i32, i32, i32
  }
  func.func @transform_2(%arg0: i32, %arg1: i32) -> (i32, i32) {
    %c0_i32 = arith.constant 0 : i32
    %c0_i32_0 = arith.constant 0 : i32
    %c0_i32_1 = arith.constant 0 : i32
    return %c0_i32, %c0_i32_0 : i32, i32
  }
  func.func @transform_3(%arg0: i32, %arg1: i32) -> (i32, i32) {
    %c0_i32 = arith.constant 0 : i32
    %c0_i32_0 = arith.constant 0 : i32
    %c0_i32_1 = arith.constant 0 : i32
    return %c0_i32, %c0_i32_0 : i32, i32
  }
  func.func @transform_4(%arg0: i32, %arg1: i32) -> (i32, i32) {
    %c0_i32 = arith.constant 0 : i32
    %c0_i32_0 = arith.constant 0 : i32
    %c0_i32_1 = arith.constant 0 : i32
    return %c0_i32, %c0_i32_0 : i32, i32
  }
  func.func @transform_5(%arg0: i32, %arg1: i32) -> (i32, i32, i32) {
    %c0_i32 = arith.constant 0 : i32
    %c0_i32_0 = arith.constant 0 : i32
    return %arg0, %c0_i32, %arg1 : i32, i32, i32
  }
}

</mosaic_0001>

<bundles_post_ra>
// kernel: tpu_custom_call.1
= control target key start
LH: loop header
LB: loop body
LE: loop exit
PB: predicated region body
PF: predicated region fallthrough
CT: control target
= control target key end

     0   :  { %10 = vsyncpa [#allocation3], 0  ;;  %s1888_s0 = inlined_call_operand.vmem [shape: f32[2,64,256], index: 0, kind: input, shape index: {}]   ;;  %s1889_s1 = inlined_call_operand.vmem [shape: f32[2,64,1], index: 1, kind: input, shape index: {}]   ;;  %s1890_s2 = inlined_call_operand.vmem [shape: bf16[192,64], index: 2, kind: input, shape index: {}]   ;;  %s1891_s3 = inlined_call_operand.vmem [shape: f32[192,1], index: 3, kind: input, shape index: {}]   ;;  %s1892_s4 = inlined_call_operand.vmem [shape: bf16[64,64], index: 4, kind: input, shape index: {}]   ;;  %s1893_s5 = inlined_call_operand.hbm [shape: bf16[2,64,256], index: 5, kind: output, shape index: {}]  }
   0x1   :  { %12 = vsyncpa [#allocation3 + $0x1], 0  ;;  %s1453_s18 = smov 0   ;;  %s1455_s19 = smov 0  }
   0x2   :  { %s1457_s20 = smov 0   ;;  %s1459_s21 = smov 0  }
   0x3   :  { %s1461_s22 = smov 0   ;;  %s1463_s23 = smov 0  }
   0x4 LB: > { %s1181_s24 = sadd.s32 4294967295, %s1417_s23   ;;  %s1182_s25 = sadd.s32 4294967294, %s1417_s23   ;;  %s1417_s23 = sphi %s1463_s23, %s18_s23   ;;  %s1413_s22 = sphi %s1461_s22, %s1900_s22   ;;  %s1409_s21 = sphi %s1459_s21, %s1899_s21   ;;  %s1405_s20 = sphi %s1457_s20, %s1898_s20   ;;  %s1401_s19 = sphi %s1455_s19, %s1897_s19   ;;  %s1397_s18 = sphi %s1453_s18, %s1896_s18  }
   0x5   : > { %s30_s26 = sadd.s32 1, %s1413_s22  ;;  %s156_s27 = sadd.s32 1, %s1405_s20 }
   0x6   : > { %p32_p0 = scmp.ge.s32.totalorder %s30_s26, 2  ;;  %p166_p1 = scmp.ne.s32.totalorder %s1405_s20, %s1401_s19 }
   0x7   : > { %p167_p2 = scmp.eq.s32.totalorder %s1181_s24, 1  ;;  %p172_p3 = scmp.ne.s32.totalorder %s1401_s19, %s1397_s18 }
   0x8   : > { %s1902_s26 = smov (%p32_p0, %s30_s26), 0  ;;  %p173_p5 = scmp.eq.s32.totalorder %s1182_s25, 1 }
   0x9   : > { %p1493_p4 = por %p167_p2, %p166_p1  ;;  %s151_s29 = ssub.s32 %s1413_s22, %s1902_s26 }
   0xa   : > { %p1185_p6 = scmp.ge.s32.totalorder %s1417_s23, 1  ;;  %p154_p7 = scmp.eq.s32.totalorder %s151_s29, 0 }
   0xb   : > { %p1500_p8 = por %p173_p5, %p172_p3  ;;  %p221_p9 = scmp.lt.s32.totalorder %s1417_s23, 3 }
   0xc   : > { %s1506_s6 = scalar_select %p154_p7, %s1405_s20, %s156_s27  }
   0xd   : > { %p222_p10 = pnand %p1185_p6, %p221_p9 }
   0xe   : > { %p259_p11 = scmp.lt.s32.totalorder (!%p222_p10), %s1409_s21, 1  ;;  %v1419_v0 = vmov (!%p222_p10), 0   ;;  %v331_v24 = vld [vmem:[%s1891_s3 + $0x40] sm:$0xff] (!%p222_p10)  ;;  %v332_v26 = vld [vmem:[%s1891_s3 + $0x48] sm:$0xff] (!%p222_p10)  ;;  %v333_v27 = vld [vmem:[%s1891_s3 + $0x50] sm:$0xff] (!%p222_p10)  ;;  %vm527_vm0 = vcmask (!%p222_p10), 523264  }
   0xf   : > { %225 = sbr.rel (%p222_p10) target bundleno = 588 (0x24c), region = 40  ;;  %596 = vmatprep.mubr.bf16.mxu0 (!%p222_p10), %v1419_v0  ;;  %676 = vmatprep.mubr.bf16.mxu1 (!%p222_p10), %v1419_v0  ;;  %v1315_v28 = vld [vmem:[%s1890_s2] sm:$0xff] (!%p222_p10)   ;;  %v334_v30 = vld [vmem:[%s1891_s3 + $0x58] sm:$0xff] (!%p222_p10)  ;;  %v336_v32 = vld [vmem:[%s1891_s3 + $0x68] sm:$0xff] (!%p222_p10)  ;;  %s255_s9 = sand.u32 (!%p222_p10), 1, %s1401_s19  }
  0x10   : > { %1313 = vset.pattern.permute.xlu0 (!%p222_p10), %v1419_v0  ;;  %1314 = vset.pattern.permute.xlu1 (!%p222_p10), %v1419_v0  ;;  %v1316_v29 = vld [vmem:[%s1890_s2 + $0x40] sm:$0xff] (!%p222_p10)   ;;  %v1317_v33 = vld [vmem:[%s1890_s2 + $0x8] sm:$0xff] (!%p222_p10)   ;;  %v337_v35 = vld [vmem:[%s1891_s3 + $0x70] sm:$0xff] (!%p222_p10)  ;;  %s1186_s10 = sshll.u32 (!%p222_p10), %s255_s9, 6  ;;  %s1420_s17 = smov (!%p222_p10), [#allocation2]  }
  0x11   : > { %389 = vperm.xlu0 (!%p222_p10), %1313, %v331_v24   ;;  %399 = vperm.xlu1 (!%p222_p10), %1314, %v333_v27   ;;  %v335_v31 = vld [vmem:[%s1891_s3 + $0x60] sm:$0xff] (!%p222_p10)  ;;  %v1318_v34 = vld [vmem:[%s1890_s2 + $0x48] sm:$0xff] (!%p222_p10)   ;;  %v338_v36 = vld [vmem:[%s1891_s3 + $0x78] sm:$0xff] (!%p222_p10)  ;;  %s1343_s24 = sshll.u32 (!%p222_p10), %s1420_s17, 4  ;;  %s1344_s24 = int_to_ptr.vmem [resolvable:$false] %s1343_s24 }
  0x12   : > { %v323_v37 = vld [vmem:[%s1891_s3] sm:$0xff] (!%p222_p10)  ;;  %v324_v38 = vld [vmem:[%s1891_s3 + $0x8] sm:$0xff] (!%p222_p10)  ;;  %v325_v39 = vld [vmem:[%s1891_s3 + $0x10] sm:$0xff] (!%p222_p10)  ;;  %s1345_s25 = scalar_lea.vmem (!%p222_p10), %s1344_s24, 2048 }
  0x13   : > { %v1319_v40 = vld [vmem:[%s1890_s2 + $0x10] sm:$0xff] (!%p222_p10)   ;;  %v326_v42 = vld [vmem:[%s1891_s3 + $0x18] sm:$0xff] (!%p222_p10)  ;;  %v327_v45 = vld [vmem:[%s1891_s3 + $0x20] sm:$0xff] (!%p222_p10) }
  0x14   : > { %v1320_v41 = vld [vmem:[%s1890_s2 + $0x50] sm:$0xff] (!%p222_p10)   ;;  %v1321_v46 = vld [vmem:[%s1890_s2 + $0x18] sm:$0xff] (!%p222_p10)   ;;  %v328_v49 = vld [vmem:[%s1891_s3 + $0x28] sm:$0xff] (!%p222_p10) }
  0x15   : > { %394 = vperm.xlu0 (!%p222_p10), %1313, %v332_v26   ;;  %404 = vperm.xlu1 (!%p222_p10), %1314, %v334_v30   ;;  %v1322_v47 = vld [vmem:[%s1890_s2 + $0x58] sm:$0xff] (!%p222_p10)   ;;  %v329_v51 = vld [vmem:[%s1891_s3 + $0x30] sm:$0xff] (!%p222_p10)  ;;  %v1323_v52 = vld [vmem:[%s1890_s2 + $0x20] sm:$0xff] (!%p222_p10)  }
  0x16   : > { %s1512_s7 = scalar_select %p259_p11, %s1409_s21, 1  ;;  %v330_v54 = vld [vmem:[%s1891_s3 + $0x38] sm:$0xff]  ;;  %v1324_v57 = vld [vmem:[%s1890_s2 + $0x28] sm:$0xff]   ;;  %v339_v59 = vld [vmem:[%s1891_s3 + $0x80] sm:$0xff] }
  0x17   : > { %v340_v60 = vld [vmem:[%s1891_s3 + $0x88] sm:$0xff]  ;;  %v341_v61 = vld [vmem:[%s1891_s3 + $0x90] sm:$0xff]  ;;  %v342_v63 = vld [vmem:[%s1891_s3 + $0x98] sm:$0xff] }
  0x18   : > { %s1236_s8 = sshll.u32 %s1512_s7, 7  ;;  %s1237_s12 = sshll.u32 %s1512_s7, 6  ;;  %v1325_v62 = vld [vmem:[%s1890_s2 + $0x30] sm:$0xff]  }
  0x19   : > { %s1520_s11 = scalar_lea.vmem %s1888_s0, %s1236_s8  ;;  %409 = vperm.xlu0 %1313, %v335_v31   ;;  %414 = vperm.xlu1 %1314, %v336_v32   ;;  %s1601_s29 = scalar_lea.vmem %s1889_s1, %s1237_s12 }
  0x1a   : > { %v276_v1 = vld [vmem:[%s1520_s11 + $0x8] sm:$0xff]  ;;  %v278_v2 = vld [vmem:[%s1520_s11 + $0x18] sm:$0xff]  ;;  %v275_v3 = vld [vmem:[%s1520_s11] sm:$0xff]  ;;  %s1246_s12 = sshll.u32 %s1409_s21, 10 }
  0x1b   : > { %v292_v4 = vpack.c.bf16 %v278_v2, %v276_v1  ;;  %v277_v5 = vld [vmem:[%s1520_s11 + $0x10] sm:$0xff]  ;;  %v280_v6 = vld [vmem:[%s1520_s11 + $0x28] sm:$0xff]  ;;  %v282_v7 = vld [vmem:[%s1520_s11 + $0x38] sm:$0xff]  ;;  %s1834_s16 = scalar_lea.hbm %s1893_s5, %s1246_s12 }
  0x1c   : > { %v291_v8 = vpack.c.bf16 %v277_v5, %v275_v3  ;;  %v294_v9 = vpack.c.bf16 %v282_v7, %v280_v6  ;;  %v279_v10 = vld [vmem:[%s1520_s11 + $0x20] sm:$0xff]  ;;  %v281_v11 = vld [vmem:[%s1520_s11 + $0x30] sm:$0xff]  ;;  %v284_v12 = vld [vmem:[%s1520_s11 + $0x48] sm:$0xff] }
  0x1d   : > { %564 = vmatprep.subr.bf16.mxu0 %v292_v4  ;;  %1247 = vmatprep.subr.bf16.mxu1 %v292_v4  ;;  %v286_v13 = vld [vmem:[%s1520_s11 + $0x58] sm:$0xff]  ;;  %v293_v14 = vpack.c.bf16 %v281_v11, %v279_v10  ;;  %v283_v15 = vld [vmem:[%s1520_s11 + $0x40] sm:$0xff]  ;;  %v285_v17 = vld [vmem:[%s1520_s11 + $0x50] sm:$0xff] }
  0x1e   : > { %565 = vmatpush1.bf16.msra.mxu0 %v291_v8  ;;  %1251 = vmatpush1.bf16.msra.mxu1 %v291_v8  ;;  %v296_v16 = vpack.c.bf16 %v286_v13, %v284_v12  ;;  %v288_v18 = vld [vmem:[%s1520_s11 + $0x68] sm:$0xff]  ;;  %v290_v19 = vld [vmem:[%s1520_s11 + $0x78] sm:$0xff]  ;;  %v295_v20 = vpack.c.bf16 %v285_v17, %v283_v15  ;;  %v287_v21 = vld [vmem:[%s1520_s11 + $0x60] sm:$0xff] }
  0x1f   : > { %566 = vmatprep.subr.bf16.mxu0 %v294_v9  ;;  %1248 = vmatprep.subr.bf16.mxu1 %v294_v9  ;;  %v298_v22 = vpack.c.bf16 %v290_v19, %v288_v18  ;;  %v289_v23 = vld [vmem:[%s1520_s11 + $0x70] sm:$0xff]  ;;  %v749_v43 = vld [vmem:[%s1601_s29] sm:$0xff]  ;;  %v750_v44 = vld [vmem:[%s1601_s29 + $0x8] sm:$0xff]  ;;  %s1800_s11 = scalar_lea.vmem [#allocation2], %s1186_s10 }
  0x20   : > { %v297_v25 = vpack.c.bf16 %v289_v23, %v287_v21  ;;  %419 = vperm.xlu0 %1313, %v337_v35   ;;  %424 = vperm.xlu1 %1314, %v338_v36   ;;  %v751_v48 = vld [vmem:[%s1601_s29 + $0x10] sm:$0xff]  ;;  %v752_v50 = vld [vmem:[%s1601_s29 + $0x18] sm:$0xff]  ;;  %v753_v53 = vld [vmem:[%s1601_s29 + $0x20] sm:$0xff]  ;;  %s1090_s13 = sshll.u32 %s1800_s11, 4  ;;  %s1836_s13 = int_to_ptr.vmem [resolvable:$true] %s1090_s13 }
  0x21   : > { %v754_v55 = vld [vmem:[%s1601_s29 + $0x28] sm:$0xff]  ;;  %v755_v56 = vld [vmem:[%s1601_s29 + $0x30] sm:$0xff]  ;;  %v756_v58 = vld [vmem:[%s1601_s29 + $0x38] sm:$0xff]  ;;  %s1842_s29 = scalar_lea.sflag [#allocation3], %s255_s9  ;;  %s1339_s21 = scalar_lea.vmem %s1836_s13, 1024 }
  0x22   : > { %567 = vmatpush1.bf16.msra.mxu0 %v293_v14  ;;  %1252 = vmatpush1.bf16.msra.mxu1 %v293_v14  ;;  %v343_v1 = vld [vmem:[%s1891_s3 + $0xa0] sm:$0xff]  ;;  %v344_v2 = vld [vmem:[%s1891_s3 + $0xa8] sm:$0xff]  ;;  %v345_v3 = vld [vmem:[%s1891_s3 + $0xb0] sm:$0xff]  ;;  %p1340_p12 = scmp.ne.s32.totalorder %s1836_s13, %s1339_s21  ;;  %p1346_p1 = scmp.lt.s32.totalorder %s1836_s13, %s1344_s24 }
  0x23   : > { %568 = vmatprep.subr.bf16.mxu0 %v296_v16  ;;  %1249 = vmatprep.subr.bf16.mxu1 %v296_v16  ;;  %v1326_v4 = vld [vmem:[%s1890_s2 + $0x38] sm:$0xff]   ;;  %p1347_p2 = scmp.lt.s32.totalorder %s1345_s25, %s1339_s21 }
  0x24   : > { %349 = vperm.xlu0 %1313, %v323_v37   ;;  %354 = vperm.xlu1 %1314, %v324_v38   ;;  %v346_v5 = vld [vmem:[%s1891_s3 + $0xb8] sm:$0xff]  ;;  %p1341_p13 = pnand %p1340_p12, %p1493_p4 }
  0x25   : > { %p1348_p3 = por %p1347_p2, %p1346_p1 }
  0x26   : > { %569 = vmatpush1.bf16.msra.mxu0 %v295_v20  ;;  %1253 = vmatpush1.bf16.msra.mxu1 %v295_v20  ;;  %p1342_p0 = pneg %p1341_p13 }
  0x27   : > { %570 = vmatprep.subr.bf16.mxu0 %v298_v22  ;;  %1250 = vmatprep.subr.bf16.mxu1 %v298_v22 }
  0x28   : > { %359 = vperm.xlu0 %1313, %v325_v39   ;;  %364 = vperm.xlu1 %1314, %v326_v42   ;;  %p1349_p5 = pnand %p1348_p3, %p1342_p0 }
  0x2a   : > { %571 = vmatpush1.bf16.msra.mxu0 %v297_v25  ;;  %1254 = vmatpush1.bf16.msra.mxu1 %v297_v25 }
  0x2c   : > { %759 = vperm.xlu0 %1313, %v749_v43   ;;  %764 = vperm.xlu1 %1314, %v750_v44  }
  0x2d   : > { %1203 = vmatmul.mubr.msk.bf16.vlgmr.msra.gmra.mrb[0].mxu0 %vm527_vm0, %v1315_v28  ;;  %1211 = vmatmul.mubr.msk.bf16.vlgmr.msra.gmra.mrb[0].mxu1 %vm527_vm0, %v1316_v29 }
  0x2e   : > { %606 = vmatprep.mubr.bf16.mxu0 %v1419_v0  ;;  %686 = vmatprep.mubr.bf16.mxu1 %v1419_v0 }
  0x30   : > { %369 = vperm.xlu0 %1313, %v327_v45   ;;  %769 = vperm.xlu1 %1314, %v751_v48  }
  0x34   : > { %374 = vperm.xlu0 %1313, %v328_v49   ;;  %774 = vperm.xlu1 %1314, %v752_v50  }
  0x35   : > { %1204 = vmatmul.mubr.msk.bf16.gmra.mrb[4].mxu0 %vm527_vm0, %v1317_v33  ;;  %1212 = vmatmul.mubr.msk.bf16.gmra.mrb[4].mxu1 %vm527_vm0, %v1318_v34 }
  0x36   : > { %616 = vmatprep.mubr.bf16.mxu0 %v1419_v0  ;;  %696 = vmatprep.mubr.bf16.mxu1 %v1419_v0 }
  0x38   : > { %379 = vperm.xlu0 %1313, %v329_v51   ;;  %779 = vperm.xlu1 %1314, %v753_v53  }
  0x3c   : > { %384 = vperm.xlu0 %1313, %v330_v54   ;;  %784 = vperm.xlu1 %1314, %v754_v55  }
  0x3d   : > { %1205 = vmatmul.mubr.msk.bf16.gmra.mrb[8].mxu0 %vm527_vm0, %v1319_v40  ;;  %1213 = vmatmul.mubr.msk.bf16.gmra.mrb[8].mxu1 %vm527_vm0, %v1320_v41 }
  0x3e   : > { %626 = vmatprep.mubr.bf16.mxu0 %v1419_v0  ;;  %706 = vmatprep.mubr.bf16.mxu1 %v1419_v0 }
  0x40   : > { %789 = vperm.xlu0 %1313, %v755_v56   ;;  %794 = vperm.xlu1 %1314, %v756_v58  }
  0x44   : > { %429 = vperm.xlu0 %1313, %v339_v59   ;;  %434 = vperm.xlu1 %1314, %v340_v60  }
  0x45   : > { %1206 = vmatmul.mubr.msk.bf16.gmra.mrb[12].mxu0 %vm527_vm0, %v1321_v46  ;;  %1214 = vmatmul.mubr.msk.bf16.gmra.mrb[12].mxu1 %vm527_vm0, %v1322_v47 }
  0x46   : > { %636 = vmatprep.mubr.bf16.mxu0 %v1419_v0  ;;  %929 = vmatprep.mubr.bf16.mxu1 %v1419_v0 }
  0x48   : > { %439 = vperm.xlu0 %1313, %v341_v61   ;;  %444 = vperm.xlu1 %1314, %v342_v63  }
  0x4c   : > { %449 = vperm.xlu0 %1313, %v343_v1   ;;  %454 = vperm.xlu1 %1314, %v344_v2  }
  0x4d   : > { %1207 = vmatmul.mubr.msk.bf16.gmra.mrb[16].mxu0 %vm527_vm0, %v1323_v52 }
  0x4e   : > { %646 = vmatprep.mubr.bf16.mxu0 %v1419_v0 }
  0x50   : > { %459 = vperm.xlu0 %1313, %v345_v3   ;;  %464 = vperm.xlu1 %1314, %v346_v5  }
  0x55   : > { %1208 = vmatmul.mubr.msk.bf16.gmra.mrb[20].mxu0 %vm527_vm0, %v1324_v57 }
  0x56   : > { %656 = vmatprep.mubr.bf16.mxu0 %v1419_v0 }
  0x5d   : > { %1209 = vmatmul.mubr.msk.bf16.gmra.mrb[24].mxu0 %vm527_vm0, %v1325_v62 }
  0x5e   : > { %666 = vmatprep.mubr.bf16.mxu0 %v1419_v0 }
  0x65   : > { %1210 = vmatmul.mubr.msk.bf16.gmra.mrb[28].mxu0 %vm527_vm0, %v1326_v4 }
  0x90   : > { %v1683_v6 = vpop.permute.xlu0 %389  ;;  %v1685_v7 = vpop.permute.xlu1 %399 }
  0x94   : > { %v1687_v8 = vpop.permute.xlu0 %394  ;;  %v1689_v9 = vpop.permute.xlu1 %404 }
  0x98   : > { %v1691_v10 = vpop.permute.xlu0 %409  ;;  %v1693_v11 = vpop.permute.xlu1 %414 }
  0x9f   : > { %v1695_v12 = vpop.permute.xlu0 %419  ;;  %v1697_v13 = vpop.permute.xlu1 %424 }
  0xa3   : > { %v350_v14 = vpop.permute.xlu0 %349  ;;  %v355_v15 = vpop.permute.xlu1 %354 }
  0xa7   : > { %v360_v16 = vpop.permute.xlu0 %359  ;;  %v365_v17 = vpop.permute.xlu1 %364 }
  0xab   : > { %v760_v18 = vpop.permute.xlu0 %759  ;;  %v765_v20 = vpop.permute.xlu1 %764 }
  0xaf   : > { %v370_v19 = vpop.permute.xlu0 %369  ;;  %v770_v22 = vpop.permute.xlu1 %769 }
  0xb3   : > { %v1699_v21 = vpop.permute.xlu0 %374  ;;  %v775_v42 = vpop.permute.xlu1 %774 }
  0xb7   : > { %v1709_v41 = vpop.permute.xlu0 %379  ;;  %v780_v2 = vpop.permute.xlu1 %779 }
  0xbb   : > { %v385_v5 = vpop.permute.xlu0 %384 }
 0x100   : > { %v598_v23 = vpop.f32.mrb[0].mxu0  ;;  %v1701_v24 = vpop.f32.mrb[0].mxu1 }
 0x101   : > { %v599_v25 = vadd.f32 %v598_v23, %v350_v14  ;;  %v600_v26 = vpop.f32.mrb[1].mxu0  ;;  %v1703_v27 = vpop.f32.mrb[1].mxu1 }
 0x102   : > { %v601_v28 = vadd.f32 %v600_v26, %v350_v14  ;;  %v602_v29 = vpop.f32.mrb[2].mxu0  ;;  %v1705_v30 = vpop.f32.mrb[2].mxu1 }
 0x103   : > { %v717_v31 = vmax.f32 %v599_v25, 0.0  ;;  %v603_v32 = vadd.f32 %v602_v29, %v355_v15  ;;  %v604_v33 = vpop.f32.mrb[3].mxu0  ;;  %v1707_v34 = vpop.f32.mrb[3].mxu1 }
 0x104   : > { %v718_v35 = vmax.f32 %v601_v28, 0.0  ;;  %v605_v36 = vadd.f32 %v604_v33, %v355_v15 }
 0x105   : > { %v719_v37 = vmax.f32 %v603_v32, 0.0  ;;  %v797_v39 = vmul.f32 %v760_v18, %v717_v31 }
 0x106   : > { %v720_v38 = vmax.f32 %v605_v36, 0.0  ;;  %v798_v43 = vmul.f32 %v760_v18, %v718_v35 }
 0x107   : > { %v799_v40 = vmul.f32 %v765_v20, %v719_v37  ;;  %v785_v37 = vpop.permute.xlu1 %784 }
 0x108   : > { %v800_v44 = vmul.f32 %v765_v20, %v720_v38  ;;  %v608_v45 = vpop.f32.mrb[4].mxu0  ;;  %v1711_v46 = vpop.f32.mrb[4].mxu1 }
 0x109   : > { %v813_v47 = vadd.f32 %v799_v40, %v797_v39  ;;  %v609_v48 = vadd.f32 %v608_v45, %v360_v16  ;;  %v610_v49 = vpop.f32.mrb[5].mxu0  ;;  %v1713_v50 = vpop.f32.mrb[5].mxu1 }
 0x10a   : > { %v826_v51 = vadd.f32 %v800_v44, %v798_v43  ;;  %v611_v52 = vadd.f32 %v610_v49, %v360_v16  ;;  %v612_v53 = vpop.f32.mrb[6].mxu0  ;;  %v1715_v54 = vpop.f32.mrb[6].mxu1 }
 0x10b   : > { %v721_v55 = vmax.f32 %v609_v48, 0.0  ;;  %v613_v56 = vadd.f32 %v612_v53, %v365_v17  ;;  %v614_v57 = vpop.f32.mrb[7].mxu0  ;;  %v1717_v58 = vpop.f32.mrb[7].mxu1 }
 0x10c   : > { %v722_v59 = vmax.f32 %v611_v52, 0.0  ;;  %v615_v60 = vadd.f32 %v614_v57, %v365_v17  ;;  %v790_v44 = vpop.permute.xlu0 %789 }
 0x10d   : > { %v801_v61 = vmul.f32 %v770_v22, %v721_v55  ;;  %v723_v62 = vmax.f32 %v613_v56, 0.0 }
 0x10e   : > { %v802_v63 = vmul.f32 %v770_v22, %v722_v59  ;;  %v724_v1 = vmax.f32 %v615_v60, 0.0 }
 0x10f   : > { %v814_v3 = vadd.f32 %v813_v47, %v801_v61  ;;  %v803_v4 = vmul.f32 %v775_v42, %v723_v62 }
 0x110   : > { %v827_v14 = vadd.f32 %v826_v51, %v802_v63  ;;  %v804_v15 = vmul.f32 %v775_v42, %v724_v1  ;;  %v618_v16 = vpop.f32.mrb[8].mxu0  ;;  %v1719_v18 = vpop.f32.mrb[8].mxu1 }
 0x111   : > { %v815_v20 = vadd.f32 %v814_v3, %v803_v4  ;;  %v619_v23 = vadd.f32 %v618_v16, %v370_v19  ;;  %v620_v25 = vpop.f32.mrb[9].mxu0  ;;  %v1721_v26 = vpop.f32.mrb[9].mxu1 }
 0x112   : > { %v828_v28 = vadd.f32 %v827_v14, %v804_v15  ;;  %v621_v17 = vadd.f32 %v620_v25, %v370_v19  ;;  %v622_v29 = vpop.f32.mrb[10].mxu0  ;;  %v1723_v31 = vpop.f32.mrb[10].mxu1 }
 0x113   : > { %v725_v22 = vmax.f32 %v619_v23, 0.0  ;;  %v623_v32 = vadd.f32 %v622_v29, %v1699_v21  ;;  %v624_v33 = vpop.f32.mrb[11].mxu0  ;;  %v1726_v35 = vpop.f32.mrb[11].mxu1 }
 0x114   : > { %v726_v36 = vmax.f32 %v621_v17, 0.0  ;;  %v625_v38 = vadd.f32 %v624_v33, %v1699_v21 }
 0x115   : > { %v805_v39 = vmul.f32 %v780_v2, %v725_v22  ;;  %v727_v40 = vmax.f32 %v623_v32, 0.0 }
 0x116   : > { %v806_v42 = vmul.f32 %v780_v2, %v726_v36  ;;  %v728_v43 = vmax.f32 %v625_v38, 0.0  ;;  %v795_v2 = vpop.permute.xlu1 %794 }
 0x117   : > { %v816_v45 = vadd.f32 %v815_v20, %v805_v39  ;;  %v807_v19 = vmul.f32 %v785_v37, %v727_v40 }
 0x118   : > { %v829_v47 = vadd.f32 %v828_v28, %v806_v42  ;;  %v808_v48 = vmul.f32 %v785_v37, %v728_v43  ;;  %v628_v49 = vpop.f32.mrb[12].mxu0  ;;  %v1729_v51 = vpop.f32.mrb[12].mxu1 }
 0x119   : > { %v817_v52 = vadd.f32 %v816_v45, %v807_v19  ;;  %v629_v53 = vadd.f32 %v628_v49, %v1709_v41  ;;  %v630_v55 = vpop.f32.mrb[13].mxu0  ;;  %v1732_v56 = vpop.f32.mrb[13].mxu1 }
 0x11a   : > { %v830_v57 = vadd.f32 %v829_v47, %v808_v48  ;;  %v631_v21 = vadd.f32 %v630_v55, %v1709_v41  ;;  %v632_v59 = vpop.f32.mrb[14].mxu0  ;;  %v1735_v60 = vpop.f32.mrb[14].mxu1 }
 0x11b   : > { %v729_v61 = vmax.f32 %v629_v53, 0.0  ;;  %v633_v62 = vadd.f32 %v632_v59, %v385_v5  ;;  %v634_v63 = vpop.f32.mrb[15].mxu0  ;;  %v1737_v1 = vpop.f32.mrb[15].mxu1 }
 0x11c   : > { %v730_v3 = vmax.f32 %v631_v21, 0.0  ;;  %v635_v4 = vadd.f32 %v634_v63, %v385_v5 }
 0x11d   : > { %v809_v14 = vmul.f32 %v790_v44, %v729_v61  ;;  %v731_v15 = vmax.f32 %v633_v62, 0.0 }
 0x11e   : > { %v810_v16 = vmul.f32 %v790_v44, %v730_v3  ;;  %v732_v20 = vmax.f32 %v635_v4, 0.0 }
 0x11f   : > { %v818_v23 = vadd.f32 %v817_v52, %v809_v14  ;;  %v811_v25 = vmul.f32 %v795_v2, %v731_v15 }
 0x120   : > { %v831_v28 = vadd.f32 %v830_v57, %v810_v16  ;;  %v812_v17 = vmul.f32 %v795_v2, %v732_v20  ;;  %v638_v41 = vpop.f32.mrb[16].mxu0 }
 0x121   : > { %v1739_v29 = vadd.f32 %v818_v23, %v811_v25  ;;  %v639_v22 = vadd.f32 %v638_v41, %v1683_v6  ;;  %v640_v32 = vpop.f32.mrb[17].mxu0 }
 0x122   : > { %v1742_v33 = vadd.f32 %v831_v28, %v812_v17  ;;  %v641_v36 = vadd.f32 %v640_v32, %v1683_v6  ;;  %v642_v37 = vpop.f32.mrb[18].mxu0 }
 0x123   : > { %v643_v5 = vadd.f32 %v642_v37, %v1687_v8  ;;  %v644_v38 = vpop.f32.mrb[19].mxu0  ;;  %v733_v40 = vmax.f32 %v639_v22, 0.0 }
 0x124   : > { %v645_v39 = vadd.f32 %v644_v38, %v1687_v8  ;;  %v734_v43 = vmax.f32 %v641_v36, 0.0 }
 0x125   : > { %v735_v42 = vmax.f32 %v643_v5, 0.0 }
 0x126   : > { %v736_v44 = vmax.f32 %v645_v39, 0.0 }
 0x127   : > { %v857_v45 = vpack.c.bf16 %v735_v42, %v733_v40 }
 0x128   : > { %v858_v19 = vpack.c.bf16 %v736_v44, %v734_v43  ;;  %v648_v47 = vpop.f32.mrb[20].mxu0 }
 0x129   : > { %v649_v48 = vadd.f32 %v648_v47, %v1685_v7  ;;  %v650_v49 = vpop.f32.mrb[21].mxu0  ;;  %v1330_v47 = vld [vmem:[%s1892_s4 + $0x18] sm:$0xff]  }
 0x12a   : > { %v651_v52 = vadd.f32 %v650_v49, %v1685_v7  ;;  %v652_v53 = vpop.f32.mrb[22].mxu0  ;;  %897 = vmatprep.subr.bf16.mxu1 %v858_v19  ;;  %v1327_v19 = vld [vmem:[%s1892_s4] sm:$0xff]   ;;  %v833_v49 = vrot.slane %v1742_v33, 4 }
 0x12b   : > { %v653_v6 = vadd.f32 %v652_v53, %v1689_v9  ;;  %v654_v55 = vpop.f32.mrb[23].mxu0  ;;  %898 = vmatpush1.bf16.msra.mxu1 %v857_v45  ;;  %v737_v57 = vmax.f32 %v649_v48, 0.0  ;;  %v820_v48 = vrot.slane %v1739_v29, 4 }
 0x12c   : > { %v655_v8 = vadd.f32 %v654_v55, %v1689_v9  ;;  %v738_v59 = vmax.f32 %v651_v52, 0.0  ;;  %v834_v53 = vadd.f32 %v833_v49, %v1742_v33 }
 0x12d   : > { %v739_v21 = vmax.f32 %v653_v6, 0.0  ;;  %v821_v52 = vadd.f32 %v820_v48, %v1739_v29 }
 0x12e   : > { %v740_v61 = vmax.f32 %v655_v8, 0.0  ;;  %v835_v55 = vrot.slane %v834_v53, 2 }
 0x12f   : > { %v859_v62 = vpack.c.bf16 %v739_v21, %v737_v57  ;;  %v822_v6 = vrot.slane %v821_v52, 2 }
 0x130   : > { %v860_v63 = vpack.c.bf16 %v740_v61, %v738_v59  ;;  %v658_v2 = vpop.f32.mrb[24].mxu0  ;;  %v836_v57 = vadd.f32 %v835_v55, %v834_v53 }
 0x131   : > { %v659_v3 = vadd.f32 %v658_v2, %v1691_v10  ;;  %v660_v4 = vpop.f32.mrb[25].mxu0  ;;  %v823_v8 = vadd.f32 %v822_v6, %v821_v52 }
 0x132   : > { %v661_v7 = vadd.f32 %v660_v4, %v1691_v10  ;;  %v662_v14 = vpop.f32.mrb[26].mxu0  ;;  %899 = vmatprep.subr.bf16.mxu1 %v860_v63 }
 0x133   : > { %v663_v15 = vadd.f32 %v662_v14, %v1693_v11  ;;  %v664_v16 = vpop.f32.mrb[27].mxu0  ;;  %900 = vmatpush1.bf16.msra.mxu1 %v859_v62  ;;  %v741_v20 = vmax.f32 %v659_v3, 0.0  ;;  %v824_v21 = vrot.slane %v823_v8, 1 }
 0x134   : > { %v665_v9 = vadd.f32 %v664_v16, %v1693_v11  ;;  %v742_v25 = vmax.f32 %v661_v7, 0.0 }
 0x135   : > { %v743_v23 = vmax.f32 %v663_v15, 0.0  ;;  %v825_v59 = vadd.f32 %v824_v21, %v823_v8  ;;  %v430_v15 = vpop.permute.xlu0 %429 }
 0x136   : > { %v744_v28 = vmax.f32 %v665_v9, 0.0 }
 0x137   : > { %v861_v17 = vpack.c.bf16 %v743_v23, %v741_v20  ;;  %v839_v62 = vsub.f32 0.0, %v825_v59  ;;  %v679_v20 = vadd.f32 %v1701_v24, %v430_v15 }
 0x138   : > { %v862_v41 = vpack.c.bf16 %v744_v28, %v742_v25  ;;  %v668_v22 = vpop.f32.mrb[28].mxu0  ;;  %v681_v28 = vadd.f32 %v1703_v27, %v430_v15 }
 0x139   : > { %v669_v32 = vadd.f32 %v668_v22, %v1695_v12  ;;  %v670_v36 = vpop.f32.mrb[29].mxu0  ;;  %v841_v2 = vmul.f32 1.442695, %v839_v62 }
 0x13a   : > { %v671_v10 = vadd.f32 %v670_v36, %v1695_v12  ;;  %v672_v37 = vpop.f32.mrb[30].mxu0  ;;  %901 = vmatprep.subr.bf16.mxu1 %v862_v41  ;;  %v1328_v12 = vld [vmem:[%s1892_s4 + $0x8] sm:$0xff]  }
 0x13b   : > { %v673_v5 = vadd.f32 %v672_v37, %v1697_v13  ;;  %v674_v38 = vpop.f32.mrb[31].mxu0  ;;  %902 = vmatpush1.bf16.msra.mxu1 %v861_v17  ;;  %v745_v39 = vmax.f32 %v669_v32, 0.0  ;;  %1331 = vpow2.f32 %v841_v2  ;;  %v435_v17 = vpop.permute.xlu1 %434 }
 0x13c   : > { %v675_v11 = vadd.f32 %v674_v38, %v1697_v13  ;;  %v746_v42 = vmax.f32 %v671_v10, 0.0  ;;  %v1329_v13 = vld [vmem:[%s1892_s4 + $0x10] sm:$0xff]   ;;  %v683_v32 = vadd.f32 %v1705_v30, %v435_v17 }
 0x13d   : > { %v747_v40 = vmax.f32 %v673_v5, 0.0  ;;  %v685_v5 = vadd.f32 %v1707_v34, %v435_v17 }
 0x13e   : > { %v748_v43 = vmax.f32 %v675_v11, 0.0 }
 0x13f   : > { %v863_v44 = vpack.c.bf16 %v747_v40, %v745_v39 }
 0x140   : > { %v864_v45 = vpack.c.bf16 %v748_v43, %v746_v42  ;;  %v440_v43 = vpop.permute.xlu0 %439 }
 0x141   : > { %v691_v34 = vadd.f32 %v1713_v50, %v440_v43 }
 0x142   : > { %903 = vmatprep.subr.bf16.mxu1 %v864_v45 }
 0x143   : > { %904 = vmatpush1.bf16.msra.mxu1 %v863_v44 }
 0x145   : > { %v1332_v4 = vpop.eup %1331 }
 0x146   : > { %1219 = vmatmul.mubr.msk.bf16.vlgmr.msra.gmra.mrb[16].mxu1 %vm527_vm0, %v1327_v19  ;;  %v845_v29 = vadd.f32 1.0, %v1332_v4  ;;  %v689_v19 = vadd.f32 %v1711_v46, %v440_v43 }
 0x147   : > { %939 = vmatprep.mubr.bf16.mxu1 %v1419_v0 }
 0x14e   : > { %1220 = vmatmul.mubr.msk.bf16.gmra.mrb[20].mxu1 %vm527_vm0, %v1328_v12 }
 0x14f   : > { %949 = vmatprep.mubr.bf16.mxu1 %v1419_v0 }
 0x156   : > { %1221 = vmatmul.mubr.msk.bf16.gmra.mrb[24].mxu1 %vm527_vm0, %v1329_v13 }
 0x157   : > { %959 = vmatprep.mubr.bf16.mxu1 %v1419_v0  ;;  %v837_v0 = vrot.slane %v836_v57, 1 }
 0x159   : > { %v838_v61 = vadd.f32 %v837_v0, %v836_v57 }
 0x15b   : > { %v840_v63 = vsub.f32 0.0, %v838_v61 }
 0x15d   : > { %v843_v3 = vmul.f32 1.442695, %v840_v63  ;;  %v450_v63 = vpop.permute.xlu0 %449 }
 0x15e   : > { %1222 = vmatmul.mubr.msk.bf16.gmra.mrb[28].mxu1 %vm527_vm0, %v1330_v47  ;;  %v445_v47 = vpop.permute.xlu1 %444  ;;  %v699_v4 = vadd.f32 %v1719_v18, %v450_v63 }
 0x15f   : > { %1333 = vpow2.f32 %v843_v3  ;;  %v693_v53 = vadd.f32 %v1715_v54, %v445_v47  ;;  %v695_v8 = vadd.f32 %v1717_v58, %v445_v47 }
 0x160   : > { %1335 = vrcp.f32 %v845_v29  ;;  %v701_v29 = vadd.f32 %v1721_v26, %v450_v63 }
 0x169   : > { %v1334_v7 = vpop.eup %1333 }
 0x16a   : > { %v846_v14 = vadd.f32 1.0, %v1334_v7  ;;  %v1782_v33 = vpop.eup %1335 }
 0x16c   : > { %1337 = vrcp.f32 %v846_v14  ;;  %v455_v14 = vpop.permute.xlu1 %454 }
 0x176   : > { %v1784_v9 = vpop.eup %1337 }
 0x219   : > { %v931_v16 = vpop.f32.mrb[16].mxu1 }
 0x21a   : > { %v970_v23 = vmul.f32 %v1782_v33, %v931_v16  ;;  %v933_v25 = vpop.f32.mrb[17].mxu1 }
 0x21b   : > { %v971_v41 = vmul.f32 %v1784_v9, %v933_v25  ;;  %v935_v22 = vpop.f32.mrb[18].mxu1 }
 0x21c   : > { %v986_v36 = vadd.f32 %v970_v23, %v679_v20  ;;  %v972_v10 = vmul.f32 %v1782_v33, %v935_v22  ;;  %v937_v37 = vpop.f32.mrb[19].mxu1  ;;  %v703_v23 = vadd.f32 %v1723_v31, %v455_v14 }
 0x21d   : > { %v987_v24 = vadd.f32 %v971_v41, %v681_v28  ;;  %v973_v38 = vmul.f32 %v1784_v9, %v937_v37  ;;  %v705_v41 = vadd.f32 %v1726_v35, %v455_v14 }
 0x21e   : > { %v1002_v11 = vmax.f32 %v986_v36, 0.0  ;;  %v988_v39 = vadd.f32 %v972_v10, %v683_v32  ;;  %v460_v36 = vpop.permute.xlu0 %459 }
 0x21f   : > { %v1003_v27 = vmax.f32 %v987_v24, 0.0  ;;  %v989_v40 = vadd.f32 %v973_v38, %v685_v5  ;;  %v465_v24 = vpop.permute.xlu1 %464 }
 0x220   : > { %v1004_v42 = vmax.f32 %v988_v39, 0.0  ;;  %v709_v39 = vadd.f32 %v1729_v51, %v460_v36  ;;  %v715_v51 = vadd.f32 %v1737_v1, %v465_v24 }
 0x221   : > { %v1238_v44 = vpack.c.bf16 %v1003_v27, %v1002_v11  ;;  %v1005_v45 = vmax.f32 %v989_v40, 0.0  ;;  %v941_v30 = vpop.f32.mrb[20].mxu1  ;;  %v711_v40 = vadd.f32 %v1732_v56, %v460_v36 }
 0x222   : > { %v974_v12 = vmul.f32 %v1782_v33, %v941_v30  ;;  %v943_v13 = vpop.f32.mrb[21].mxu1 }
 0x223   : > { %1066 = vst [vmem:[%s1800_s11] sm:$0xff] %v1238_v44  ;;  %v1239_v48 = vpack.c.bf16 %v1005_v45, %v1004_v42  ;;  %v975_v49 = vmul.f32 %v1784_v9, %v943_v13  ;;  %v945_v52 = vpop.f32.mrb[22].mxu1  ;;  %v713_v45 = vadd.f32 %v1735_v60, %v465_v24 }
 0x224   : > { %v990_v6 = vadd.f32 %v974_v12, %v689_v19  ;;  %v976_v46 = vmul.f32 %v1782_v33, %v945_v52  ;;  %v947_v55 = vpop.f32.mrb[23].mxu1 }
 0x225   : > { %1067 = vst [vmem:[%s1800_s11 + $0x8] sm:$0xff] %v1239_v48  ;;  %v991_v50 = vadd.f32 %v975_v49, %v691_v34  ;;  %v977_v57 = vmul.f32 %v1784_v9, %v947_v55 }
 0x226   : > { %v1006_v21 = vmax.f32 %v990_v6, 0.0  ;;  %v992_v0 = vadd.f32 %v976_v46, %v693_v53 }
 0x227   : > { %v1007_v59 = vmax.f32 %v991_v50, 0.0  ;;  %v993_v61 = vadd.f32 %v977_v57, %v695_v8 }
 0x228   : > { %v1008_v62 = vmax.f32 %v992_v0, 0.0 }
 0x229   : > { %v1240_v2 = vpack.c.bf16 %v1007_v59, %v1006_v21  ;;  %v1009_v3 = vmax.f32 %v993_v61, 0.0  ;;  %v951_v54 = vpop.f32.mrb[24].mxu1 }
 0x22a   : > { %v978_v7 = vmul.f32 %v1782_v33, %v951_v54  ;;  %v953_v58 = vpop.f32.mrb[25].mxu1 }
 0x22b   : > { %1068 = vst [vmem:[%s1800_s11 + $0x10] sm:$0xff] %v1240_v2  ;;  %v1241_v15 = vpack.c.bf16 %v1009_v3, %v1008_v62  ;;  %v979_v16 = vmul.f32 %v1784_v9, %v953_v58  ;;  %v955_v20 = vpop.f32.mrb[26].mxu1 }
 0x22c   : > { %v994_v25 = vadd.f32 %v978_v7, %v699_v4  ;;  %v980_v28 = vmul.f32 %v1782_v33, %v955_v20  ;;  %v957_v17 = vpop.f32.mrb[27].mxu1 }
 0x22d   : > { %1069 = vst [vmem:[%s1800_s11 + $0x18] sm:$0xff] %v1241_v15  ;;  %v995_v18 = vadd.f32 %v979_v16, %v701_v29  ;;  %v981_v22 = vmul.f32 %v1784_v9, %v957_v17 }
 0x22e   : > { %v1010_v26 = vmax.f32 %v994_v25, 0.0  ;;  %v996_v32 = vadd.f32 %v980_v28, %v703_v23 }
 0x22f   : > { %v1011_v10 = vmax.f32 %v995_v18, 0.0  ;;  %v997_v37 = vadd.f32 %v981_v22, %v705_v41 }
 0x230   : > { %v1012_v5 = vmax.f32 %v996_v32, 0.0 }
 0x231   : > { %v1242_v38 = vpack.c.bf16 %v1011_v10, %v1010_v26  ;;  %v1013_v31 = vmax.f32 %v997_v37, 0.0  ;;  %v961_v11 = vpop.f32.mrb[28].mxu1 }
 0x232   : > { %v982_v35 = vmul.f32 %v1782_v33, %v961_v11  ;;  %v963_v27 = vpop.f32.mrb[29].mxu1 }
 0x233   : > { %1070 = vst [vmem:[%s1800_s11 + $0x20] sm:$0xff] %v1242_v38  ;;  %v1243_v42 = vpack.c.bf16 %v1013_v31, %v1012_v5  ;;  %v983_v43 = vmul.f32 %v1784_v9, %v963_v27  ;;  %v965_v44 = vpop.f32.mrb[30].mxu1 }
 0x234   : > { %v998_v30 = vadd.f32 %v982_v35, %v709_v39  ;;  %v984_v19 = vmul.f32 %v1782_v33, %v965_v44  ;;  %v967_v12 = vpop.f32.mrb[31].mxu1 }
 0x235   : > { %1071 = vst [vmem:[%s1800_s11 + $0x28] sm:$0xff] %v1243_v42  ;;  %v999_v13 = vadd.f32 %v983_v43, %v711_v40  ;;  %v985_v56 = vmul.f32 %v1784_v9, %v967_v12 }
 0x236   : > { %v1014_v34 = vmax.f32 %v998_v30, 0.0  ;;  %v1000_v47 = vadd.f32 %v984_v19, %v713_v45 }
 0x237   : > { %v1015_v48 = vmax.f32 %v999_v13, 0.0  ;;  %v1001_v49 = vadd.f32 %v985_v56, %v715_v51 }
 0x238   : > { %v1016_v60 = vmax.f32 %v1000_v47, 0.0 }
 0x239   : > { %v1244_v52 = vpack.c.bf16 %v1015_v48, %v1014_v34  ;;  %v1017_v33 = vmax.f32 %v1001_v49, 0.0 }
 0x23b   : > { %1072 = vst [vmem:[%s1800_s11 + $0x30] sm:$0xff] %v1244_v52  ;;  %v1245_v1 = vpack.c.bf16 %v1017_v33, %v1016_v60 }
 0x23d   : > { %1073 = vst [vmem:[%s1800_s11 + $0x38] sm:$0xff] %v1245_v1 }
 0x23e   : > { %1352 = shalt.err (!%p1349_p5)
}
 0x23f   : > { %s1353_s27 = scalar_lea.hbm %s1834_s16, 1024  ;;  %s1357_s9 = scalar_lea.hbm %s1893_s5, 2048 }
 0x240   : > { %p1354_p6 = scmp.ne.s32.totalorder %s1834_s16, %s1353_s27  ;;  %p1358_p10 = scmp.lt.u32.totalorder %s1834_s16, %s1893_s5 }
 0x241   : > { %p1359_p11 = scmp.lt.u32.totalorder %s1357_s9, %s1353_s27  ;;  %p1361_p13 = scmp.lt.u32.totalorder %s1353_s27, %s1834_s16 }
 0x242   : > { %p1355_p7 = pnand %p1354_p6, %p1493_p4 }
 0x243   : > { %p1360_p12 = por %p1359_p11, %p1358_p10 }
 0x244   : > { %p1356_p9 = pneg %p1355_p7 }
 0x245   : > { %p1362_p0 = por %p1361_p13, %p1360_p12 }
 0x247   : > { %p1363_p1 = pnand %p1362_p0, %p1356_p9 }
 0x249   : > { %1366 = shalt.err (!%p1363_p1)
}
 0x24a   : > { %s1421_s12 = smov 128   ;;  %s1422_s14 = smov 8  }
 0x24b   : > { %1255 = dma.vmem_to_hbm [thread:$0]  (%p1493_p4), %s1836_s13, 1024, %s1834_s16, %s1842_s29, %s1421_s12, %s1421_s12, %s1422_s14  }
 0x24c PF: > { %p1261_p2 = scmp.ge.s32.totalorder %s1417_s23, 2  ;;  %s1105_s15 = sand.u32 1, %s1397_s18  }
 0x24d   : > { %s1106_s21 = scalar_lea.sflag [#allocation3], %s1105_s15 }
 0x24e   : > { %p1258_p3 = pnand %p1261_p2, %p1500_p8 }
 0x250   : > { %1392 = dma.done.wait (!%p1258_p3), %s1106_s21, 1024  }
 0x251   : > { %1394 = vsyncadd (!%p1258_p3), %s1106_s21, 4294966272  ;;  %s18_s23 = sadd.s32 1, %s1417_s23   ;;  %s1896_s18 = smov %s1401_s19 }
 0x252   : > { %p15_p5 = scmp.ge.s32.totalorder %s18_s23, 4   ;;  %s1897_s19 = smov %s1405_s20 }
 0x253   : > { %s1898_s20 = smov %s1506_s6  ;;  %s1899_s21 = smov %s1413_s22 }
 0x254   : > { %s1900_s22 = smov %s1902_s26  ;;  %17 = sbr.rel (!%p15_p5) target bundleno = 4 (0x4), region = 78 }
 0x25b   :  { %1111 = vsyncpa [#allocation3], 1 }
 0x25c   :  { %1113 = vsyncpa [#allocation3 + $0x1], 1 }

</bundles_post_ra>
